<compile_context>
chip_gen: v7x
topology: tpu7x:2x2x1
jax: 0.10.0
libtpu: 0.0.40
codegen_flags: <defaults>
</compile_context>

<pallas_src>
import jax
import jax.numpy as jnp
from jax import lax
from jax.experimental import pallas as pl
from jax.experimental.pallas import tpu as pltpu


def _make_kernel(G, A, num_classes, HW_pad):
    C_out = 5 + num_classes
    AC = A * C_out

    def kernel(img_ref, dims_ref, anch_ref, gts_ref, out_ref):
        # img_ref:  SMEM (2,)      int32  (img_h, img_w)
        # dims_ref: SMEM (L, 2)    int32  per-level (H, W)
        # anch_ref: VMEM (1, 2, A) f32    per-level anchors, row0 = w, row1 = h
        # gts_ref:  VMEM (1, G, 6) f32    (cx, cy, w, h, cls, valid), normalized
        # out_ref:  VMEM (1, 1, AC, HW_pad) f32   lane-dense targets
        lvl = pl.program_id(0)
        H_f = dims_ref[lvl, 0].astype(jnp.float32)
        W_f = dims_ref[lvl, 1].astype(jnp.float32)
        img_h = img_ref[0].astype(jnp.float32)
        img_w = img_ref[1].astype(jnp.float32)

        gts = gts_ref[0]                                   # [G, 6]
        cxn = gts[:, 0:1]                                  # normalized center x
        cyn = gts[:, 1:2]
        gw = jnp.maximum(gts[:, 2:3] * img_w, 1e-6)        # pixels
        gh = jnp.maximum(gts[:, 3:4] * img_h, 1e-6)
        cls_i = gts[:, 4:5].astype(jnp.int32)
        valid = (gts[:, 5:6] > 0.5).astype(jnp.float32)    # [G, 1]

        # --- grid-cell assignment (clamped) & regression offsets ------------
        # cx / stride_x == cxn * W  (gts are normalized), so no scalar division.
        gxf = cxn * W_f
        gyf = cyn * H_f
        gx = jnp.clip(jnp.floor(gxf), 0.0, W_f - 1.0)
        gy = jnp.clip(jnp.floor(gyf), 0.0, H_f - 1.0)
        tx = gxf - gx                                      # [G, 1]
        ty = gyf - gy
        cell = (gy * W_f + gx).astype(jnp.int32)           # [G, 1], in [0, H*W)

        c_iota = lax.broadcasted_iota(jnp.int32, (G, HW_pad), 1)
        cell_eq = (cell == c_iota).astype(jnp.float32)     # [G, HW_pad] one-hot

        # --- best anchor per GT via wh-IoU (vectorized, first tie wins) -----
        anch = anch_ref[0]                                 # [2, A]
        aw = anch[0:1, :]                                  # [1, A]
        ah = anch[1:2, :]
        inter = jnp.minimum(gw, aw) * jnp.minimum(gh, ah)  # [G, A]
        union = gw * gh + aw * ah - inter
        iou = inter / union
        row_max = jnp.max(iou, axis=1, keepdims=True)      # [G, 1]
        is_max = (iou >= row_max).astype(jnp.float32)      # ties -> all ones
        tri = (lax.broadcasted_iota(jnp.int32, (A, A), 0)
               < lax.broadcasted_iota(jnp.int32, (A, A), 1)).astype(jnp.float32)
        prev = lax.dot_general(is_max, tri, (((1,), (0,)), ((), ())),
                               preferred_element_type=jnp.float32)   # [G, A]
        one_hot_a = is_max * (prev < 0.5).astype(jnp.float32)  # first max only
        match_v = one_hot_a * valid                         # [G, A]

        # --- collision resolution: last write wins ---------------------------
        same_anchor = lax.dot_general(match_v, match_v, (((1,), (1,)), ((), ())),
                                      preferred_element_type=jnp.float32)
        same_cell = lax.dot_general(cell_eq, cell_eq, (((1,), (1,)), ((), ())),
                                    preferred_element_type=jnp.float32)
        same = same_anchor * same_cell                     # [G, G]
        gi = lax.broadcasted_iota(jnp.int32, (G, G), 0)
        gj = lax.broadcasted_iota(jnp.int32, (G, G), 1)
        later = (gj > gi).astype(jnp.float32)
        has_later = jnp.sum(same * later, axis=1, keepdims=True)   # [G, 1]
        keep = (has_later < 0.5).astype(jnp.float32)
        match_f = match_v * keep                           # [G, A]

        # --- per-GT target rows for all anchors fused: [G, A*C_out] ----------
        log_gw = jnp.log(gw)                               # hoisted EUP logs
        log_gh = jnp.log(gh)
        tw_all = log_gw - jnp.log(aw)                      # [G, A]
        th_all = log_gh - jnp.log(ah)
        k_iota = lax.broadcasted_iota(jnp.int32, (G, AC), 1)
        vals_all = jnp.zeros((G, AC), jnp.float32)
        for a in range(A):   # A is small & static; these are single-vreg VPU ops
            c = k_iota - a * C_out                         # local channel index
            slab = (jnp.where(c == 0, tx, 0.0)
                    + jnp.where(c == 1, ty, 0.0)
                    + jnp.where(c == 2, tw_all[:, a:a + 1], 0.0)
                    + jnp.where(c == 3, th_all[:, a:a + 1], 0.0)
                    + jnp.where(c == 4, 1.0, 0.0)
                    + jnp.where((c >= 5) & (c < C_out) & ((c - 5) == cls_i),
                                1.0, 0.0))
            vals_all = vals_all + slab * match_f[:, a:a + 1]

        # --- single MXU scatter + single lane-dense store ---------------------
        # [A*C_out, HW_pad] = vals_all^T . cell_eq  (contract over G)
        out_val = lax.dot_general(vals_all, cell_eq, (((0,), (0,)), ((), ())),
                                  preferred_element_type=jnp.float32)
        out_ref[0, 0] = out_val.astype(out_ref.dtype)

    return kernel


def yolov4_target(features, anchors, gts, image_size, num_classes=20):
    """Mirror of Yolov4Target.forward(features, anchors, gts, image_size).

    features:   list of NCHW feature maps (one per detection level)
    anchors:    int/float [L, A, 2] per-level anchor (w, h) in pixels
    gts:        float32 [B, G, 6] = (cx, cy, w, h, cls, valid), normalized
    image_size: int32 [2] = (img_h, img_w)
    returns:    list of float32 [B, A, H, W, 5 + num_classes] target tensors
    """
    L = len(features)
    B, G, _ = gts.shape
    A = anchors.shape[1]
    C_out = 5 + num_classes
    AC = A * C_out

    dims = [(int(f.shape[2]), int(f.shape[3])) for f in features]
    HW_max = max(h * w for h, w in dims)
    HW_pad = max(128, ((HW_max + 127) // 128) * 128)       # lane-dense, 128-aligned

    level_dims = jnp.array(dims, jnp.int32)                # [L, 2]
    anchors_t = jnp.transpose(jnp.asarray(anchors, jnp.float32),
                              (0, 2, 1))                   # [L, 2, A]
    image_size = jnp.asarray(image_size, jnp.int32)
    gts = jnp.asarray(gts, jnp.float32)

    kernel = _make_kernel(G, A, num_classes, HW_pad)

    grid_spec = pltpu.PrefetchScalarGridSpec(
        num_scalar_prefetch=2,                 # image_size, level_dims -> SMEM
        grid=(L, B),
        in_specs=[
            pl.BlockSpec((1, 2, A), lambda l, b, img, dms: (l, 0, 0)),
            pl.BlockSpec((1, G, 6), lambda l, b, img, dms: (b, 0, 0)),
        ],
        out_specs=pl.BlockSpec((1, 1, AC, HW_pad),
                               lambda l, b, img, dms: (l, b, 0, 0)),
    )

    out = pl.pallas_call(
        kernel,
        out_shape=jax.ShapeDtypeStruct((L, B, AC, HW_pad), jnp.float32),
        grid_spec=grid_spec,
        compiler_params=pltpu.CompilerParams(
            dimension_semantics=("parallel", "parallel")),
    )(image_size, level_dims, anchors_t, gts)

    # Tiny per-level slice / reshape / transpose back to [B, A, H, W, C_out].
    outs = []
    for lvl, (h, w) in enumerate(dims):
        r = out[lvl, :, :, :h * w].reshape(B, A, C_out, h, w)
        outs.append(jnp.transpose(r, (0, 1, 3, 4, 2)))
    return outs


if __name__ == "__main__":
    key = jax.random.PRNGKey(0)
    B, C, NC = 2, 4, 20
    A, G = 3, 8
    IMG = 128

    # Two pyramid levels (strides 8 and 16).
    k1, k2, k3, k4, k5 = jax.random.split(key, 5)
    features = [
        jax.random.normal(k1, (B, C, 16, 16), jnp.float32),
        jax.random.normal(k2, (B, C, 8, 8), jnp.float32),
    ]
    anchors = jnp.array(
        [[[12, 16], [19, 36], [40, 28]],
         [[36, 75], [76, 55], [72, 146]]], jnp.int32)        # [L, A, 2]

    cxy = jax.random.uniform(k3, (B, G, 2), minval=0.1, maxval=0.9)
    wh = jax.random.uniform(k4, (B, G, 2), minval=0.05, maxval=0.3)
    cls = jax.random.randint(k5, (B, G, 1), 0, NC).astype(jnp.float32)
    valid = (jax.random.uniform(jax.random.fold_in(key, 7), (B, G, 1))
             > 0.3).astype(jnp.float32)
    gts = jnp.concatenate([cxy, wh, cls, valid], axis=-1).astype(jnp.float32)

    image_size = jnp.array([IMG, IMG], jnp.int32)

    targets = yolov4_target(features, anchors, gts, image_size, num_classes=NC)
    jax.block_until_ready(targets)
    print("KERNEL_OK")
</pallas_src>

<mosaic_0001>
module attributes {stable_mosaic.version = 11 : i64} {
  func.func @kernel(%arg0: i32, %arg1: i32, %arg2: memref<2xi32, #tpu.memory_space<smem>>, %arg3: memref<2x2xi32, #tpu.memory_space<smem>>, %arg4: memref<1x2x3xf32, #tpu.memory_space<vmem>>, %arg5: memref<1x8x6xf32, #tpu.memory_space<vmem>>, %arg6: memref<1x1x75x256xf32, #tpu.memory_space<vmem>>) attributes {dimension_semantics = [#tpu.dimension_semantics<parallel>, #tpu.dimension_semantics<parallel>], iteration_bounds = array<i64: 2, 2>, scalar_prefetch = 2 : i64, scratch_operands = 0 : i64, tpu.core_type = #tpu.core_type<tc>, window_params = [{transform_indices = @transform_0, window_bounds = array<i64: 1, 2, 3>}, {transform_indices = @transform_1, window_bounds = array<i64: 1, 8, 6>}, {transform_indices = @transform_2, window_bounds = array<i64: 1, 1, 75, 256>}]} {
    %0 = arith.index_cast %arg0 : i32 to index
    %c0 = arith.constant 0 : index
    %1 = memref.load %arg3[%0, %c0] : memref<2x2xi32, #tpu.memory_space<smem>>
    %2 = arith.sitofp %1 : i32 to f32
    %3 = arith.index_cast %arg0 : i32 to index
    %c1 = arith.constant 1 : index
    %4 = memref.load %arg3[%3, %c1] : memref<2x2xi32, #tpu.memory_space<smem>>
    %5 = arith.sitofp %4 : i32 to f32
    %c0_0 = arith.constant 0 : index
    %6 = memref.load %arg2[%c0_0] : memref<2xi32, #tpu.memory_space<smem>>
    %7 = arith.sitofp %6 : i32 to f32
    %c1_1 = arith.constant 1 : index
    %8 = memref.load %arg2[%c1_1] : memref<2xi32, #tpu.memory_space<smem>>
    %9 = arith.sitofp %8 : i32 to f32
    %c0_2 = arith.constant 0 : index
    %c0_3 = arith.constant 0 : index
    %c0_4 = arith.constant 0 : index
    %10 = vector.load %arg5[%c0_2, %c0_3, %c0_4] : memref<1x8x6xf32, #tpu.memory_space<vmem>>, vector<1x8x6xf32>
    %11 = vector.shape_cast %10 : vector<1x8x6xf32> to vector<8x6xf32>
    %12 = vector.extract_strided_slice %11 {offsets = [0, 0], sizes = [8, 1], strides = [1, 1]} : vector<8x6xf32> to vector<8x1xf32>
    %13 = vector.extract_strided_slice %11 {offsets = [0, 1], sizes = [8, 1], strides = [1, 1]} : vector<8x6xf32> to vector<8x1xf32>
    %14 = vector.extract_strided_slice %11 {offsets = [0, 2], sizes = [8, 1], strides = [1, 1]} : vector<8x6xf32> to vector<8x1xf32>
    %15 = vector.broadcast %9 : f32 to vector<8x1xf32>
    %16 = arith.mulf %14, %15 : vector<8x1xf32>
    %cst = arith.constant 9.99999997E-7 : f32
    %17 = vector.broadcast %cst : f32 to vector<8x1xf32>
    %18 = arith.maximumf %16, %17 : vector<8x1xf32>
    %19 = vector.extract_strided_slice %11 {offsets = [0, 3], sizes = [8, 1], strides = [1, 1]} : vector<8x6xf32> to vector<8x1xf32>
    %20 = vector.broadcast %7 : f32 to vector<8x1xf32>
    %21 = arith.mulf %19, %20 : vector<8x1xf32>
    %cst_5 = arith.constant 9.99999997E-7 : f32
    %22 = vector.broadcast %cst_5 : f32 to vector<8x1xf32>
    %23 = arith.maximumf %21, %22 : vector<8x1xf32>
    %24 = vector.extract_strided_slice %11 {offsets = [0, 4], sizes = [8, 1], strides = [1, 1]} : vector<8x6xf32> to vector<8x1xf32>
    %25 = arith.fptosi %24 : vector<8x1xf32> to vector<8x1xi32>
    %26 = vector.extract_strided_slice %11 {offsets = [0, 5], sizes = [8, 1], strides = [1, 1]} : vector<8x6xf32> to vector<8x1xf32>
    %cst_6 = arith.constant 5.000000e-01 : f32
    %27 = vector.broadcast %cst_6 : f32 to vector<8x1xf32>
    %28 = arith.cmpf ogt, %26, %27 : vector<8x1xf32>
    %29 = arith.extui %28 : vector<8x1xi1> to vector<8x1xi32>
    %30 = arith.sitofp %29 : vector<8x1xi32> to vector<8x1xf32>
    %31 = vector.broadcast %5 : f32 to vector<8x1xf32>
    %32 = arith.mulf %12, %31 : vector<8x1xf32>
    %33 = vector.broadcast %2 : f32 to vector<8x1xf32>
    %34 = arith.mulf %13, %33 : vector<8x1xf32>
    %35 = math.floor %32 : vector<8x1xf32>
    %cst_7 = arith.constant 1.000000e+00 : f32
    %36 = arith.subf %5, %cst_7 : f32
    %cst_8 = arith.constant 0.000000e+00 : f32
    %37 = vector.broadcast %cst_8 : f32 to vector<8x1xf32>
    %38 = arith.maximumf %37, %35 : vector<8x1xf32>
    %39 = vector.broadcast %36 : f32 to vector<8x1xf32>
    %40 = arith.minimumf %39, %38 : vector<8x1xf32>
    %41 = math.floor %34 : vector<8x1xf32>
    %cst_9 = arith.constant 1.000000e+00 : f32
    %42 = arith.subf %2, %cst_9 : f32
    %cst_10 = arith.constant 0.000000e+00 : f32
    %43 = vector.broadcast %cst_10 : f32 to vector<8x1xf32>
    %44 = arith.maximumf %43, %41 : vector<8x1xf32>
    %45 = vector.broadcast %42 : f32 to vector<8x1xf32>
    %46 = arith.minimumf %45, %44 : vector<8x1xf32>
    %47 = arith.subf %32, %40 : vector<8x1xf32>
    %48 = arith.subf %34, %46 : vector<8x1xf32>
    %49 = vector.broadcast %5 : f32 to vector<8x1xf32>
    %50 = arith.mulf %46, %49 : vector<8x1xf32>
    %51 = arith.addf %50, %40 : vector<8x1xf32>
    %52 = arith.fptosi %51 : vector<8x1xf32> to vector<8x1xi32>
    %53 = tpu.iota {dimensions = array<i32: 1>} : vector<8x256xi32>
    %54 = vector.broadcast %52 : vector<8x1xi32> to vector<8x256xi32>
    %55 = arith.cmpi eq, %54, %53 : vector<8x256xi32>
    %56 = arith.extui %55 : vector<8x256xi1> to vector<8x256xi32>
    %57 = arith.sitofp %56 : vector<8x256xi32> to vector<8x256xf32>
    %c0_11 = arith.constant 0 : index
    %c0_12 = arith.constant 0 : index
    %c0_13 = arith.constant 0 : index
    %58 = vector.load %arg4[%c0_11, %c0_12, %c0_13] : memref<1x2x3xf32, #tpu.memory_space<vmem>>, vector<1x2x3xf32>
    %59 = vector.shape_cast %58 : vector<1x2x3xf32> to vector<2x3xf32>
    %60 = vector.extract_strided_slice %59 {offsets = [0, 0], sizes = [1, 3], strides = [1, 1]} : vector<2x3xf32> to vector<1x3xf32>
    %61 = vector.extract_strided_slice %59 {offsets = [1, 0], sizes = [1, 3], strides = [1, 1]} : vector<2x3xf32> to vector<1x3xf32>
    %62 = vector.broadcast %18 : vector<8x1xf32> to vector<8x3xf32>
    %63 = vector.broadcast %60 : vector<1x3xf32> to vector<8x3xf32>
    %64 = arith.minimumf %62, %63 : vector<8x3xf32>
    %65 = vector.broadcast %23 : vector<8x1xf32> to vector<8x3xf32>
    %66 = vector.broadcast %61 : vector<1x3xf32> to vector<8x3xf32>
    %67 = arith.minimumf %65, %66 : vector<8x3xf32>
    %68 = arith.mulf %64, %67 : vector<8x3xf32>
    %69 = arith.mulf %18, %23 : vector<8x1xf32>
    %70 = arith.mulf %60, %61 : vector<1x3xf32>
    %71 = vector.broadcast %69 : vector<8x1xf32> to vector<8x3xf32>
    %72 = vector.broadcast %70 : vector<1x3xf32> to vector<8x3xf32>
    %73 = arith.addf %71, %72 : vector<8x3xf32>
    %74 = arith.subf %73, %68 : vector<8x3xf32>
    %75 = arith.divf %68, %74 : vector<8x3xf32>
    %cst_14 = arith.constant dense<0xFF800000> : vector<8xf32>
    %76 = vector.multi_reduction <maximumf>, %75, %cst_14 [1] : vector<8x3xf32> to vector<8xf32>
    %77 = vector.shape_cast %76 : vector<8xf32> to vector<8x1xf32>
    %78 = vector.broadcast %77 : vector<8x1xf32> to vector<8x3xf32>
    %79 = arith.cmpf oge, %75, %78 : vector<8x3xf32>
    %80 = arith.extui %79 : vector<8x3xi1> to vector<8x3xi32>
    %81 = arith.sitofp %80 : vector<8x3xi32> to vector<8x3xf32>
    %82 = tpu.iota {dimensions = array<i32: 0>} : vector<3x3xi32>
    %83 = tpu.iota {dimensions = array<i32: 1>} : vector<3x3xi32>
    %84 = arith.cmpi slt, %82, %83 : vector<3x3xi32>
    %85 = arith.extui %84 : vector<3x3xi1> to vector<3x3xi32>
    %86 = arith.sitofp %85 : vector<3x3xi32> to vector<3x3xf32>
    %cst_15 = arith.constant dense<0.000000e+00> : vector<8x3xf32>
    %87 = tpu.matmul %81, %86, %cst_15 {dimension_numbers = #tpu.dot_dimension_numbers<[1], [0], [0], [1], [0, 0, 1, 1], [], []>} : vector<8x3xf32>, vector<3x3xf32>, vector<8x3xf32> -> vector<8x3xf32>
    %cst_16 = arith.constant 5.000000e-01 : f32
    %88 = vector.broadcast %cst_16 : f32 to vector<8x3xf32>
    %89 = arith.cmpf olt, %87, %88 : vector<8x3xf32>
    %90 = arith.extui %89 : vector<8x3xi1> to vector<8x3xi32>
    %91 = arith.sitofp %90 : vector<8x3xi32> to vector<8x3xf32>
    %92 = arith.mulf %81, %91 : vector<8x3xf32>
    %93 = vector.broadcast %30 : vector<8x1xf32> to vector<8x3xf32>
    %94 = arith.mulf %92, %93 : vector<8x3xf32>
    %cst_17 = arith.constant dense<0.000000e+00> : vector<8x8xf32>
    %95 = tpu.matmul %94, %94, %cst_17 {dimension_numbers = #tpu.dot_dimension_numbers<[1], [1], [0], [0], [0, 0, 1, 0], [], []>} : vector<8x3xf32>, vector<8x3xf32>, vector<8x8xf32> -> vector<8x8xf32>
    %cst_18 = arith.constant dense<0.000000e+00> : vector<8x8xf32>
    %96 = tpu.matmul %57, %57, %cst_18 {dimension_numbers = #tpu.dot_dimension_numbers<[1], [1], [0], [0], [0, 0, 1, 0], [], []>} : vector<8x256xf32>, vector<8x256xf32>, vector<8x8xf32> -> vector<8x8xf32>
    %97 = arith.mulf %95, %96 : vector<8x8xf32>
    %98 = tpu.iota {dimensions = array<i32: 0>} : vector<8x8xi32>
    %99 = tpu.iota {dimensions = array<i32: 1>} : vector<8x8xi32>
    %100 = arith.cmpi sgt, %99, %98 : vector<8x8xi32>
    %101 = arith.extui %100 : vector<8x8xi1> to vector<8x8xi32>
    %102 = arith.sitofp %101 : vector<8x8xi32> to vector<8x8xf32>
    %103 = arith.mulf %97, %102 : vector<8x8xf32>
    %cst_19 = arith.constant dense<0.000000e+00> : vector<8xf32>
    %104 = vector.multi_reduction <add>, %103, %cst_19 [1] : vector<8x8xf32> to vector<8xf32>
    %105 = vector.shape_cast %104 : vector<8xf32> to vector<8x1xf32>
    %cst_20 = arith.constant 5.000000e-01 : f32
    %106 = vector.broadcast %cst_20 : f32 to vector<8x1xf32>
    %107 = arith.cmpf olt, %105, %106 : vector<8x1xf32>
    %108 = arith.extui %107 : vector<8x1xi1> to vector<8x1xi32>
    %109 = arith.sitofp %108 : vector<8x1xi32> to vector<8x1xf32>
    %110 = vector.broadcast %109 : vector<8x1xf32> to vector<8x3xf32>
    %111 = arith.mulf %94, %110 : vector<8x3xf32>
    %112 = math.log %18 : vector<8x1xf32>
    %113 = math.log %23 : vector<8x1xf32>
    %114 = math.log %60 : vector<1x3xf32>
    %115 = vector.broadcast %112 : vector<8x1xf32> to vector<8x3xf32>
    %116 = vector.broadcast %114 : vector<1x3xf32> to vector<8x3xf32>
    %117 = arith.subf %115, %116 : vector<8x3xf32>
    %118 = math.log %61 : vector<1x3xf32>
    %119 = vector.broadcast %113 : vector<8x1xf32> to vector<8x3xf32>
    %120 = vector.broadcast %118 : vector<1x3xf32> to vector<8x3xf32>
    %121 = arith.subf %119, %120 : vector<8x3xf32>
    %122 = tpu.iota {dimensions = array<i32: 1>} : vector<8x75xi32>
    %cst_21 = arith.constant 0.000000e+00 : f32
    %123 = vector.broadcast %cst_21 : f32 to vector<8x75xf32>
    %c0_i32 = arith.constant 0 : i32
    %124 = vector.broadcast %c0_i32 : i32 to vector<8x75xi32>
    %125 = arith.subi %122, %124 : vector<8x75xi32>
    %c0_i32_22 = arith.constant 0 : i32
    %126 = vector.broadcast %c0_i32_22 : i32 to vector<8x75xi32>
    %127 = arith.cmpi eq, %125, %126 : vector<8x75xi32>
    %cst_23 = arith.constant 0.000000e+00 : f32
    %128 = vector.shape_cast %47 : vector<8x1xf32> to vector<8x1xf32>
    %129 = vector.broadcast %128 : vector<8x1xf32> to vector<8x75xf32>
    %130 = vector.broadcast %cst_23 : f32 to vector<8x75xf32>
    %131 = arith.select %127, %129, %130 : vector<8x75xi1>, vector<8x75xf32>
    %c1_i32 = arith.constant 1 : i32
    %132 = vector.broadcast %c1_i32 : i32 to vector<8x75xi32>
    %133 = arith.cmpi eq, %125, %132 : vector<8x75xi32>
    %cst_24 = arith.constant 0.000000e+00 : f32
    %134 = vector.shape_cast %48 : vector<8x1xf32> to vector<8x1xf32>
    %135 = vector.broadcast %134 : vector<8x1xf32> to vector<8x75xf32>
    %136 = vector.broadcast %cst_24 : f32 to vector<8x75xf32>
    %137 = arith.select %133, %135, %136 : vector<8x75xi1>, vector<8x75xf32>
    %138 = arith.addf %131, %137 : vector<8x75xf32>
    %c2_i32 = arith.constant 2 : i32
    %139 = vector.broadcast %c2_i32 : i32 to vector<8x75xi32>
    %140 = arith.cmpi eq, %125, %139 : vector<8x75xi32>
    %141 = vector.extract_strided_slice %117 {offsets = [0, 0], sizes = [8, 1], strides = [1, 1]} : vector<8x3xf32> to vector<8x1xf32>
    %cst_25 = arith.constant 0.000000e+00 : f32
    %142 = vector.shape_cast %141 : vector<8x1xf32> to vector<8x1xf32>
    %143 = vector.broadcast %142 : vector<8x1xf32> to vector<8x75xf32>
    %144 = vector.broadcast %cst_25 : f32 to vector<8x75xf32>
    %145 = arith.select %140, %143, %144 : vector<8x75xi1>, vector<8x75xf32>
    %146 = arith.addf %138, %145 : vector<8x75xf32>
    %c3_i32 = arith.constant 3 : i32
    %147 = vector.broadcast %c3_i32 : i32 to vector<8x75xi32>
    %148 = arith.cmpi eq, %125, %147 : vector<8x75xi32>
    %149 = vector.extract_strided_slice %121 {offsets = [0, 0], sizes = [8, 1], strides = [1, 1]} : vector<8x3xf32> to vector<8x1xf32>
    %cst_26 = arith.constant 0.000000e+00 : f32
    %150 = vector.shape_cast %149 : vector<8x1xf32> to vector<8x1xf32>
    %151 = vector.broadcast %150 : vector<8x1xf32> to vector<8x75xf32>
    %152 = vector.broadcast %cst_26 : f32 to vector<8x75xf32>
    %153 = arith.select %148, %151, %152 : vector<8x75xi1>, vector<8x75xf32>
    %154 = arith.addf %146, %153 : vector<8x75xf32>
    %c4_i32 = arith.constant 4 : i32
    %155 = vector.broadcast %c4_i32 : i32 to vector<8x75xi32>
    %156 = arith.cmpi eq, %125, %155 : vector<8x75xi32>
    %cst_27 = arith.constant 1.000000e+00 : f32
    %cst_28 = arith.constant 0.000000e+00 : f32
    %157 = vector.broadcast %cst_27 : f32 to vector<8x75xf32>
    %158 = vector.broadcast %cst_28 : f32 to vector<8x75xf32>
    %159 = arith.select %156, %157, %158 : vector<8x75xi1>, vector<8x75xf32>
    %160 = arith.addf %154, %159 : vector<8x75xf32>
    %c5_i32 = arith.constant 5 : i32
    %161 = vector.broadcast %c5_i32 : i32 to vector<8x75xi32>
    %162 = arith.cmpi sge, %125, %161 : vector<8x75xi32>
    %c25_i32 = arith.constant 25 : i32
    %163 = vector.broadcast %c25_i32 : i32 to vector<8x75xi32>
    %164 = arith.cmpi slt, %125, %163 : vector<8x75xi32>
    %165 = arith.andi %162, %164 : vector<8x75xi1>
    %c5_i32_29 = arith.constant 5 : i32
    %166 = vector.broadcast %c5_i32_29 : i32 to vector<8x75xi32>
    %167 = arith.subi %125, %166 : vector<8x75xi32>
    %168 = vector.broadcast %25 : vector<8x1xi32> to vector<8x75xi32>
    %169 = arith.cmpi eq, %167, %168 : vector<8x75xi32>
    %170 = arith.andi %165, %169 : vector<8x75xi1>
    %cst_30 = arith.constant 1.000000e+00 : f32
    %cst_31 = arith.constant 0.000000e+00 : f32
    %171 = vector.broadcast %cst_30 : f32 to vector<8x75xf32>
    %172 = vector.broadcast %cst_31 : f32 to vector<8x75xf32>
    %173 = arith.select %170, %171, %172 : vector<8x75xi1>, vector<8x75xf32>
    %174 = arith.addf %160, %173 : vector<8x75xf32>
    %175 = vector.extract_strided_slice %111 {offsets = [0, 0], sizes = [8, 1], strides = [1, 1]} : vector<8x3xf32> to vector<8x1xf32>
    %176 = vector.broadcast %175 : vector<8x1xf32> to vector<8x75xf32>
    %177 = arith.mulf %174, %176 : vector<8x75xf32>
    %178 = arith.addf %123, %177 : vector<8x75xf32>
    %c25_i32_32 = arith.constant 25 : i32
    %179 = vector.broadcast %c25_i32_32 : i32 to vector<8x75xi32>
    %180 = arith.subi %122, %179 : vector<8x75xi32>
    %c0_i32_33 = arith.constant 0 : i32
    %181 = vector.broadcast %c0_i32_33 : i32 to vector<8x75xi32>
    %182 = arith.cmpi eq, %180, %181 : vector<8x75xi32>
    %cst_34 = arith.constant 0.000000e+00 : f32
    %183 = vector.shape_cast %47 : vector<8x1xf32> to vector<8x1xf32>
    %184 = vector.broadcast %183 : vector<8x1xf32> to vector<8x75xf32>
    %185 = vector.broadcast %cst_34 : f32 to vector<8x75xf32>
    %186 = arith.select %182, %184, %185 : vector<8x75xi1>, vector<8x75xf32>
    %c1_i32_35 = arith.constant 1 : i32
    %187 = vector.broadcast %c1_i32_35 : i32 to vector<8x75xi32>
    %188 = arith.cmpi eq, %180, %187 : vector<8x75xi32>
    %cst_36 = arith.constant 0.000000e+00 : f32
    %189 = vector.shape_cast %48 : vector<8x1xf32> to vector<8x1xf32>
    %190 = vector.broadcast %189 : vector<8x1xf32> to vector<8x75xf32>
    %191 = vector.broadcast %cst_36 : f32 to vector<8x75xf32>
    %192 = arith.select %188, %190, %191 : vector<8x75xi1>, vector<8x75xf32>
    %193 = arith.addf %186, %192 : vector<8x75xf32>
    %c2_i32_37 = arith.constant 2 : i32
    %194 = vector.broadcast %c2_i32_37 : i32 to vector<8x75xi32>
    %195 = arith.cmpi eq, %180, %194 : vector<8x75xi32>
    %196 = vector.extract_strided_slice %117 {offsets = [0, 1], sizes = [8, 1], strides = [1, 1]} : vector<8x3xf32> to vector<8x1xf32>
    %cst_38 = arith.constant 0.000000e+00 : f32
    %197 = vector.shape_cast %196 : vector<8x1xf32> to vector<8x1xf32>
    %198 = vector.broadcast %197 : vector<8x1xf32> to vector<8x75xf32>
    %199 = vector.broadcast %cst_38 : f32 to vector<8x75xf32>
    %200 = arith.select %195, %198, %199 : vector<8x75xi1>, vector<8x75xf32>
    %201 = arith.addf %193, %200 : vector<8x75xf32>
    %c3_i32_39 = arith.constant 3 : i32
    %202 = vector.broadcast %c3_i32_39 : i32 to vector<8x75xi32>
    %203 = arith.cmpi eq, %180, %202 : vector<8x75xi32>
    %204 = vector.extract_strided_slice %121 {offsets = [0, 1], sizes = [8, 1], strides = [1, 1]} : vector<8x3xf32> to vector<8x1xf32>
    %cst_40 = arith.constant 0.000000e+00 : f32
    %205 = vector.shape_cast %204 : vector<8x1xf32> to vector<8x1xf32>
    %206 = vector.broadcast %205 : vector<8x1xf32> to vector<8x75xf32>
    %207 = vector.broadcast %cst_40 : f32 to vector<8x75xf32>
    %208 = arith.select %203, %206, %207 : vector<8x75xi1>, vector<8x75xf32>
    %209 = arith.addf %201, %208 : vector<8x75xf32>
    %c4_i32_41 = arith.constant 4 : i32
    %210 = vector.broadcast %c4_i32_41 : i32 to vector<8x75xi32>
    %211 = arith.cmpi eq, %180, %210 : vector<8x75xi32>
    %cst_42 = arith.constant 1.000000e+00 : f32
    %cst_43 = arith.constant 0.000000e+00 : f32
    %212 = vector.broadcast %cst_42 : f32 to vector<8x75xf32>
    %213 = vector.broadcast %cst_43 : f32 to vector<8x75xf32>
    %214 = arith.select %211, %212, %213 : vector<8x75xi1>, vector<8x75xf32>
    %215 = arith.addf %209, %214 : vector<8x75xf32>
    %c5_i32_44 = arith.constant 5 : i32
    %216 = vector.broadcast %c5_i32_44 : i32 to vector<8x75xi32>
    %217 = arith.cmpi sge, %180, %216 : vector<8x75xi32>
    %c25_i32_45 = arith.constant 25 : i32
    %218 = vector.broadcast %c25_i32_45 : i32 to vector<8x75xi32>
    %219 = arith.cmpi slt, %180, %218 : vector<8x75xi32>
    %220 = arith.andi %217, %219 : vector<8x75xi1>
    %c5_i32_46 = arith.constant 5 : i32
    %221 = vector.broadcast %c5_i32_46 : i32 to vector<8x75xi32>
    %222 = arith.subi %180, %221 : vector<8x75xi32>
    %223 = vector.broadcast %25 : vector<8x1xi32> to vector<8x75xi32>
    %224 = arith.cmpi eq, %222, %223 : vector<8x75xi32>
    %225 = arith.andi %220, %224 : vector<8x75xi1>
    %cst_47 = arith.constant 1.000000e+00 : f32
    %cst_48 = arith.constant 0.000000e+00 : f32
    %226 = vector.broadcast %cst_47 : f32 to vector<8x75xf32>
    %227 = vector.broadcast %cst_48 : f32 to vector<8x75xf32>
    %228 = arith.select %225, %226, %227 : vector<8x75xi1>, vector<8x75xf32>
    %229 = arith.addf %215, %228 : vector<8x75xf32>
    %230 = vector.extract_strided_slice %111 {offsets = [0, 1], sizes = [8, 1], strides = [1, 1]} : vector<8x3xf32> to vector<8x1xf32>
    %231 = vector.broadcast %230 : vector<8x1xf32> to vector<8x75xf32>
    %232 = arith.mulf %229, %231 : vector<8x75xf32>
    %233 = arith.addf %178, %232 : vector<8x75xf32>
    %c50_i32 = arith.constant 50 : i32
    %234 = vector.broadcast %c50_i32 : i32 to vector<8x75xi32>
    %235 = arith.subi %122, %234 : vector<8x75xi32>
    %c0_i32_49 = arith.constant 0 : i32
    %236 = vector.broadcast %c0_i32_49 : i32 to vector<8x75xi32>
    %237 = arith.cmpi eq, %235, %236 : vector<8x75xi32>
    %cst_50 = arith.constant 0.000000e+00 : f32
    %238 = vector.shape_cast %47 : vector<8x1xf32> to vector<8x1xf32>
    %239 = vector.broadcast %238 : vector<8x1xf32> to vector<8x75xf32>
    %240 = vector.broadcast %cst_50 : f32 to vector<8x75xf32>
    %241 = arith.select %237, %239, %240 : vector<8x75xi1>, vector<8x75xf32>
    %c1_i32_51 = arith.constant 1 : i32
    %242 = vector.broadcast %c1_i32_51 : i32 to vector<8x75xi32>
    %243 = arith.cmpi eq, %235, %242 : vector<8x75xi32>
    %cst_52 = arith.constant 0.000000e+00 : f32
    %244 = vector.shape_cast %48 : vector<8x1xf32> to vector<8x1xf32>
    %245 = vector.broadcast %244 : vector<8x1xf32> to vector<8x75xf32>
    %246 = vector.broadcast %cst_52 : f32 to vector<8x75xf32>
    %247 = arith.select %243, %245, %246 : vector<8x75xi1>, vector<8x75xf32>
    %248 = arith.addf %241, %247 : vector<8x75xf32>
    %c2_i32_53 = arith.constant 2 : i32
    %249 = vector.broadcast %c2_i32_53 : i32 to vector<8x75xi32>
    %250 = arith.cmpi eq, %235, %249 : vector<8x75xi32>
    %251 = vector.extract_strided_slice %117 {offsets = [0, 2], sizes = [8, 1], strides = [1, 1]} : vector<8x3xf32> to vector<8x1xf32>
    %cst_54 = arith.constant 0.000000e+00 : f32
    %252 = vector.shape_cast %251 : vector<8x1xf32> to vector<8x1xf32>
    %253 = vector.broadcast %252 : vector<8x1xf32> to vector<8x75xf32>
    %254 = vector.broadcast %cst_54 : f32 to vector<8x75xf32>
    %255 = arith.select %250, %253, %254 : vector<8x75xi1>, vector<8x75xf32>
    %256 = arith.addf %248, %255 : vector<8x75xf32>
    %c3_i32_55 = arith.constant 3 : i32
    %257 = vector.broadcast %c3_i32_55 : i32 to vector<8x75xi32>
    %258 = arith.cmpi eq, %235, %257 : vector<8x75xi32>
    %259 = vector.extract_strided_slice %121 {offsets = [0, 2], sizes = [8, 1], strides = [1, 1]} : vector<8x3xf32> to vector<8x1xf32>
    %cst_56 = arith.constant 0.000000e+00 : f32
    %260 = vector.shape_cast %259 : vector<8x1xf32> to vector<8x1xf32>
    %261 = vector.broadcast %260 : vector<8x1xf32> to vector<8x75xf32>
    %262 = vector.broadcast %cst_56 : f32 to vector<8x75xf32>
    %263 = arith.select %258, %261, %262 : vector<8x75xi1>, vector<8x75xf32>
    %264 = arith.addf %256, %263 : vector<8x75xf32>
    %c4_i32_57 = arith.constant 4 : i32
    %265 = vector.broadcast %c4_i32_57 : i32 to vector<8x75xi32>
    %266 = arith.cmpi eq, %235, %265 : vector<8x75xi32>
    %cst_58 = arith.constant 1.000000e+00 : f32
    %cst_59 = arith.constant 0.000000e+00 : f32
    %267 = vector.broadcast %cst_58 : f32 to vector<8x75xf32>
    %268 = vector.broadcast %cst_59 : f32 to vector<8x75xf32>
    %269 = arith.select %266, %267, %268 : vector<8x75xi1>, vector<8x75xf32>
    %270 = arith.addf %264, %269 : vector<8x75xf32>
    %c5_i32_60 = arith.constant 5 : i32
    %271 = vector.broadcast %c5_i32_60 : i32 to vector<8x75xi32>
    %272 = arith.cmpi sge, %235, %271 : vector<8x75xi32>
    %c25_i32_61 = arith.constant 25 : i32
    %273 = vector.broadcast %c25_i32_61 : i32 to vector<8x75xi32>
    %274 = arith.cmpi slt, %235, %273 : vector<8x75xi32>
    %275 = arith.andi %272, %274 : vector<8x75xi1>
    %c5_i32_62 = arith.constant 5 : i32
    %276 = vector.broadcast %c5_i32_62 : i32 to vector<8x75xi32>
    %277 = arith.subi %235, %276 : vector<8x75xi32>
    %278 = vector.broadcast %25 : vector<8x1xi32> to vector<8x75xi32>
    %279 = arith.cmpi eq, %277, %278 : vector<8x75xi32>
    %280 = arith.andi %275, %279 : vector<8x75xi1>
    %cst_63 = arith.constant 1.000000e+00 : f32
    %cst_64 = arith.constant 0.000000e+00 : f32
    %281 = vector.broadcast %cst_63 : f32 to vector<8x75xf32>
    %282 = vector.broadcast %cst_64 : f32 to vector<8x75xf32>
    %283 = arith.select %280, %281, %282 : vector<8x75xi1>, vector<8x75xf32>
    %284 = arith.addf %270, %283 : vector<8x75xf32>
    %285 = vector.extract_strided_slice %111 {offsets = [0, 2], sizes = [8, 1], strides = [1, 1]} : vector<8x3xf32> to vector<8x1xf32>
    %286 = vector.broadcast %285 : vector<8x1xf32> to vector<8x75xf32>
    %287 = arith.mulf %284, %286 : vector<8x75xf32>
    %288 = arith.addf %233, %287 : vector<8x75xf32>
    %cst_65 = arith.constant dense<0.000000e+00> : vector<75x256xf32>
    %289 = tpu.matmul %288, %57, %cst_65 {dimension_numbers = #tpu.dot_dimension_numbers<[0], [0], [1], [1], [0, 1, 1, 1], [], []>} : vector<8x75xf32>, vector<8x256xf32>, vector<75x256xf32> -> vector<75x256xf32>
    %c0_66 = arith.constant 0 : index
    %c0_67 = arith.constant 0 : index
    %c0_68 = arith.constant 0 : index
    %c0_69 = arith.constant 0 : index
    %290 = vector.load %arg6[%c0_66, %c0_67, %c0_68, %c0_69] : memref<1x1x75x256xf32, #tpu.memory_space<vmem>>, vector<1x1x75x256xf32>
    %291 = vector.shape_cast %290 : vector<1x1x75x256xf32> to vector<75x256xf32>
    %292 = vector.shape_cast %289 : vector<75x256xf32> to vector<1x1x75x256xf32>
    tpu.vector_store %arg6[%c0_66, %c0_67, %c0_68, %c0_69], %292 {strides = array<i32>} : memref<1x1x75x256xf32, #tpu.memory_space<vmem>>, vector<1x1x75x256xf32>,
    return
  }
  func.func @transform_0(%arg0: i32, %arg1: i32, %arg2: memref<2xi32, #tpu.memory_space<smem>>, %arg3: memref<2x2xi32, #tpu.memory_space<smem>>) -> (i32, i32, i32) {
    %c0_i32 = arith.constant 0 : i32
    %c0_i32_0 = arith.constant 0 : i32
    %c0_i32_1 = arith.constant 0 : i32
    return %arg0, %c0_i32, %c0_i32_0 : i32, i32, i32
  }
  func.func @transform_1(%arg0: i32, %arg1: i32, %arg2: memref<2xi32, #tpu.memory_space<smem>>, %arg3: memref<2x2xi32, #tpu.memory_space<smem>>) -> (i32, i32, i32) {
    %c0_i32 = arith.constant 0 : i32
    %c0_i32_0 = arith.constant 0 : i32
    %c0_i32_1 = arith.constant 0 : i32
    return %arg1, %c0_i32, %c0_i32_0 : i32, i32, i32
  }
  func.func @transform_2(%arg0: i32, %arg1: i32, %arg2: memref<2xi32, #tpu.memory_space<smem>>, %arg3: memref<2x2xi32, #tpu.memory_space<smem>>) -> (i32, i32, i32, i32) {
    %c0_i32 = arith.constant 0 : i32
    %c0_i32_0 = arith.constant 0 : i32
    %c0_i32_1 = arith.constant 0 : i32
    return %arg0, %arg1, %c0_i32, %c0_i32_0 : i32, i32, i32, i32
  }
}

</mosaic_0001>

<bundles_post_ra>
// kernel: tpu_custom_call.1
= control target key start
LH: loop header
LB: loop body
LE: loop exit
PB: predicated region body
PF: predicated region fallthrough
CT: control target
= control target key end

     0   :  { %s1478_s0 = inlined_call_operand.vmem [shape: s32[2], index: 0, kind: input, shape index: {}]   ;;  %s1479_s2 = inlined_call_operand.vmem [shape: f32[2,2,3], index: 2, kind: input, shape index: {}]   ;;  %s1480_s3 = inlined_call_operand.vmem [shape: f32[2,8,6], index: 3, kind: input, shape index: {}]   ;;  %s1481_s4 = inlined_call_operand.vmem [shape: f32[2,2,75,256], index: 4, kind: output, shape index: {}]   ;;  %s1482_s1 = inlined_call_operand.vmem [shape: s32[2,2], index: 1, kind: input, shape index: {}]  }
   0x1   :  { %s9_s17 = sshll.u32 %s1478_s0, 4  ;;  %s13_s20 = sshll.u32 %s1482_s1, 4  ;;  %s10_s17 = int_to_ptr.vmem [resolvable:$true] %s9_s17  ;;  %s14_s20 = int_to_ptr.vmem [resolvable:$true] %s13_s20 }
   0x2   :  { %s1152_s21 = scalar_lea.vmem %s10_s17, 16  ;;  %p1157_p1 = scmp.lt.s32.totalorder %s10_s17, %s10_s17 }
   0x3   :  { %p1153_p0 = scmp.ne.s32.totalorder %s10_s17, %s1152_s21  ;;  %p1158_p2 = scmp.lt.s32.totalorder %s1152_s21, %s1152_s21 }
   0x5   :  { %p1159_p3 = por %p1158_p2, %p1157_p1 }
   0x7   :  { %p1160_p4 = pnand %p1159_p3, %p1153_p0 }
   0x9   :  { %1163 = shalt.err (!%p1160_p4)  }
   0xa   :  { %s1218_s22 = smov [#allocation3]   ;;  %s1164_s23 = scalar_lea.vmem %s14_s20, 32 }
   0xb   :  { %12 = dma.vmem_to_smem %s10_s17, 16, %s1218_s22, [#allocation2] }
   0xc   :  { %p1165_p5 = scmp.ne.s32.totalorder %s14_s20, %s1164_s23  ;;  %p1169_p6 = scmp.lt.s32.totalorder %s14_s20, %s14_s20 }
   0xd   :  { %p1170_p7 = scmp.lt.s32.totalorder %s1164_s23, %s1164_s23 }
   0xf   :  { %p1171_p8 = por %p1170_p7, %p1169_p6 }
  0x11   :  { %p1172_p9 = pnand %p1171_p8, %p1165_p5 }
  0x13   :  { %1175 = shalt.err (!%p1172_p9)  }
  0x14   :  { %s1219_s0 = smov [#allocation4]  }
  0x15   :  { %16 = dma.vmem_to_smem %s14_s20, 32, %s1219_s0, [#allocation2] }
  0x16   :  { %1196 = dma.done.wait [#allocation2], 48 }
  0x17   :  { %1197 = vsyncadd [#allocation2], 4294967248 }
  0x18   :  { %18 = sfence }
  0x19   :  { %s1262_s1 = smov 0   ;;  %s1264_s24 = smov 0  }
  0x1a   :  { %s1266_s25 = smov 0   ;;  %s1268_s26 = smov 0  }
  0x1b   :  { %s1270_s27 = smov 0  }
  0x1c LB: > { %s33_s28 = sadd.s32 1, %s1208_s25  ;;  %s36_s29 = sadd.s32 1, %s1212_s26  ;;  %s1216_s27 = sphi %s1270_s27, %s24_s27   ;;  %s1212_s26 = sphi %s1268_s26, %s1497_s26   ;;  %s1208_s25 = sphi %s1266_s25, %s1496_s25   ;;  %s1204_s24 = sphi %s1264_s24, %s1495_s24   ;;  %s1200_s1 = sphi %s1262_s1, %s1494_s1  }
  0x1d   : > { %p34_p10 = scmp.ge.s32.totalorder %s33_s28, 2  ;;  %p1007_p11 = scmp.ge.s32.totalorder %s1216_s27, 1 }
  0x1e   : > { %p146_p12 = scmp.lt.s32.totalorder %s1216_s27, 5 }
  0x1f   : > { %s1499_s28 = smov (%p34_p10, %s33_s28), 0  ;;  %s1501_s29 = smov (!%p34_p10, %s36_s29), %s1212_s26 }
  0x20   : > { %p147_p13 = pnand %p1007_p11, %p146_p12  ;;  %p38_p0 = scmp.ge.s32.totalorder %s1501_s29, 2 }
  0x21   : > { %p179_p1 = scmp.lt.s32.totalorder (!%p147_p13), %s1200_s1, 1  ;;  %s198_s30 = sld [smem:[#allocation3]] (!%p147_p13)  ;;  %v1220_v0 = vmov (!%p147_p13), 3   ;;  %v1221_v1 = vmov (!%p147_p13), 2   ;;  %v1223_v11 = vmov (!%p147_p13), 0.0   ;;  %v236_v18 = vlaneseq (!%p147_p13) }
  0x22   : > { %s1503_s29 = smov (%p38_p0, %s1501_s29), 0  ;;  %150 = sbr.rel (%p147_p13) target bundleno = 1565 (0x61d), region = 28 }
  0x23   : > { %1126 = vset.pattern.permute.xlu1 (!%p147_p13), %v1220_v0  ;;  %1125 = vset.pattern.permute.xlu0 (!%p147_p13), %v1221_v1  ;;  %s1012_s5 = sld [smem:[#allocation3 + $0x1]] (!%p147_p13)  ;;  %p175_p2 = scmp.lt.s32.totalorder (!%p147_p13), %s1204_s24, 1  ;;  %v1326_v19 = vshrl.u32 (!%p147_p13), %v236_v18, 7  ;;  %vm291_vm0 = vcmask (!%p147_p13), 23552   ;;  %v1346_v41 = vand.u32 (!%p147_p13), 127, %v236_v18  ;;  %vm306_vm2 = vcmask (!%p147_p13), 1042432  }
  0x24   : > { %s1222_s12 = smov (!%p147_p13), 127   ;;  %s1011_s17 = sshll.u32 (!%p147_p13), %s1204_s24, 7  ;;  %1054 = vmatprep.subr.mxu0 (!%p147_p13), %v1223_v11  ;;  %848 = vmatprep.mubr.f32.mxu1 (!%p147_p13), %v1223_v11  ;;  %vm1225_vm3 = vmmov (!%p147_p13), 0   ;;  %v1226_v52 = vmov (!%p147_p13), 1   ;;  %v1227_v53 = vmov (!%p147_p13), 0   ;;  %v1228_v56 = vmov (!%p147_p13), 5  }
  0x25   : > { %s195_s18 = sadd.s32 (!%p147_p13), 1, %s1011_s17  ;;  %s1224_s22 = smov (!%p147_p13), 1   ;;  %v266_v21 = vsub.s32 (!%p147_p13), 1, %v1326_v19  ;;  %v1332_v22 = vsub.s32 (!%p147_p13), 0, %v1326_v19  ;;  %vm300_vm1 = vcmp.lt.s32.totalorder (!%p147_p13), %v1326_v19, %v1346_v41  ;;  %1056 = vmatprep.mubr.msk.f32.mxu0 (!%p147_p13), %vm1225_vm3, %v1223_v11  ;;  %vm534_vm9 = vcmp.gt.s32.totalorder (!%p147_p13), %v1346_v41, %v1326_v19 }
  0x26   : > { %s196_s19 = sld [smem:[#allocation4 + %s195_s18]] (!%p147_p13)  ;;  %v1019_v45 = vsel (!%p147_p13), %vm300_vm1, 1.0, %v1223_v11  ;;  %vm1483_vm10 = vcmask (!%p147_p13), 64512   ;;  %vm579_vm14 = vcmp.eq.s32.totalorder (!%p147_p13), %v1346_v41, 1  ;;  %vm572_vm15 = vcmp.eq.s32.totalorder (!%p147_p13), %v1346_v41, 0 }
  0x27   : > { %s199_s10 = scvt.s32.f32 (!%p147_p13), %s198_s30  ;;  %1055 = vmatpush3.msk.msra.mxu0 (!%p147_p13), %vm306_vm2, %v1019_v45  ;;  %vm587_vm2 = vcmp.eq.s32.totalorder (!%p147_p13), %v1346_v41, 2 }
  0x28   : > { %1059 = vmatprep.subr.mxu0 (!%p147_p13), %v1223_v11 }
  0x29   : > { %s1505_s1 = smov (!%p179_p1, %s1200_s1), 1  ;;  %s201_s11 = scvt.s32.f32 %s1012_s5  ;;  %v206_v3 = vstv %s199_s10 }
  0x2a   : > { %s1009_s6 = sshll.u32 %s1505_s1, 3  ;;  %s1066_s13 = smul.u32 20, %s1505_s1 }
  0x2b   : > { %s182_s9 = scalar_lea.vmem %s1480_s3, %s1009_s6  ;;  %v203_v5 = vstv %s201_s11  ;;  %s193_s5 = sld [smem:[#allocation4 + %s1011_s17]] }
  0x2c   : > { %v1299_v2 = vld [vmem:[%s182_s9] sm:$0xff]  ;;  %s176_s14 = scalar_select %p175_p2, %s1204_s24, 1 }
  0x2d   : > { %v207_v4 = vmul.f32 %v206_v3, %v1299_v2  ;;  %v204_v6 = vmul.f32 %v203_v5, %v1299_v2  ;;  %s197_s20 = scvt.s32.f32 %s196_s19  ;;  %vm210_vm4 = vcmp.gt.f32.partialorder %v1299_v2, 0.5 }
  0x2e   : > { %s1067_s15 = smul.u32 40, %s176_s14  ;;  %s1008_s23 = sshll.u32 %s176_s14, 1  ;;  %v1013_v57 = vsel %vm210_vm4, 1.0, %v1223_v11  ;;  %vm595_vm4 = vcmp.eq.s32.totalorder %v1346_v41, 3 }
  0x2f   : > { %v208_v7 = vmax.f32 %v207_v4, 1e-06  ;;  %v205_v8 = vmax.f32 %v204_v6, 1e-06  ;;  %v1313_v12 = vstv %s197_s20  ;;  %s1014_s21 = sadd.f32 -1.0, %s197_s20  ;;  %s178_s30 = scalar_lea.vmem %s1479_s2, %s1008_s23 }
  0x30   : > { %s1306_s16 = sadd.s32 %s1067_s15, %s1066_s13  ;;  %v1317_v13 = vmul.f32 %v1313_v12, %v1299_v2  ;;  %v1328_v20 = vld [vmem:[%s178_s30] sm:$0x3] }
  0x31   : > { %270 = vrot.lane.b32.xlu0 %v208_v7, %s1222_s12  ;;  %261 = vperm.xlu1 %1126, %v208_v7   ;;  %v220_v15 = vstv %s1014_s21  ;;  %v275_v23 = vrot.slane %v1328_v20, 1  ;;  %v267_v24 = vrot.slane %v1328_v20, %v266_v21  ;;  %v257_v25 = vrot.slane %v1328_v20, %v1332_v22  ;;  %s194_s6 = scvt.s32.f32 %s193_s5  ;;  %s1010_s24 = sshll.u32 %s1306_s16, 3 }
  0x32   : > { %v217_v14 = vfloor.f32 %v1317_v13  ;;  %s1441_s10 = scalar_lea.vmem %s1481_s4, %s1010_s24 }
  0x33   : > { %v277_v26 = vmul.f32 %v275_v23, %v1328_v20  ;;  %v215_v39 = vstv %s194_s6  ;;  %s1015_s7 = sadd.f32 -1.0, %s194_s6  ;;  %v1230_v23 = vmov 4  }
  0x34   : > { %v219_v16 = vmax.f32 %v217_v14, 0.0  ;;  %v216_v40 = vmul.f32 %v215_v39, %v1299_v2  ;;  %v1229_v14 = vmov 1.0  }
  0x35   : > { %251 = vperm.xlu0 %1125, %v205_v8   ;;  %1127 = vset.pattern.permute.xlu1 %v1221_v1  ;;  %v286_v31 = vrot.slane %v277_v26, %v1332_v22  ;;  %v225_v48 = vstv %s1015_s7 }
  0x36   : > { %v1320_v17 = vmin.f32 %v220_v15, %v219_v16  ;;  %v222_v43 = vfloor.f32 %v216_v40 }
  0x38   : > { %v224_v47 = vmax.f32 %v222_v43, 0.0 }
  0x39   : > { %231 = vrot.lane.b32.xlu0 %v1320_v17, %s1224_s22 }
  0x3a   : > { %v226_v50 = vmin.f32 %v225_v48, %v224_v47  ;;  %1128 = vset.pattern.permute.xlu0 %v1228_v56 }
  0x3c   : > { %v228_v51 = vsub.f32 %v216_v40, %v226_v50  ;;  %v229_v54 = vmul.f32 %v226_v50, %v1313_v12  ;;  %v1034_v40 = vadd.s32 4294967246, %v1346_v41 }
  0x3d   : > { %386 = vperm.xlu0 %1128, %v1013_v57  }
  0x3e   : > { %vm662_vm1 = vcmp.eq.s32.totalorder %v1034_v40, 0 }
  0x41   : > { %1129 = vset.pattern.permute.xlu0 %v1226_v52 }
  0xa3   : > { %v271_v9 = vpop.permute.xlu0 %270 }
  0xa4   : > { %v273_v10 = vmul.f32 %v271_v9, %v205_v8 }
  0xa6   : > { %280 = vperm.xlu1 %1127, %v273_v10   ;;  %v238_v10 = vadd.s32 128, %v1346_v41 }
  0xb0   : > { %v262_v27 = vpop.permute.xlu1 %261 }
  0xb1   : > { %v268_v29 = vmin.f32 %v262_v27, %v267_v24 }
  0xb4   : > { %v252_v28 = vpop.permute.xlu0 %251 }
  0xb5   : > { %v258_v30 = vmin.f32 %v252_v28, %v257_v25  ;;  %v1029_v28 = vsel %vm534_vm9, 1.0, %v1223_v11  ;;  %vm674_vm9 = vcmp.eq.s32.totalorder %v1034_v40, 3 }
  0xb7   : > { %v269_v33 = vmul.f32 %v268_v29, %v258_v30 }
  0xb8   : > { %v232_v55 = vpop.permute.xlu0 %231 }
  0xb9   : > { %v234_v58 = vadd.f32 %v232_v55, %v229_v54 }
  0xbb   : > { %v1070_v59 = vtrunc.f32 %v234_v58 }
  0xbc   : > { %v387_v9 = vpop.permute.xlu0 %386 }
  0xbd   : > { %v1071_v60 = vcvt.f32.s32 %v1070_v59  ;;  %v1031_v59 = vadd.s32 4294967291, %v1346_v41 }
  0xbf   : > { %240 = vperm.xlu0 %1129, %v1071_v60  }
  0xc3   : > { %1131 = vset.pattern.permute.xlu0 %v1227_v53 }
 0x125   : > { %v281_v32 = vpop.permute.xlu1 %280 }
 0x126   : > { %v287_v34 = vadd.f32 %v286_v31, %v281_v32  ;;  %v227_v32 = vsub.f32 %v1317_v13, %v1320_v17  ;;  %v1032_v13 = vadd.s32 4294967271, %v1346_v41 }
 0x128   : > { %v288_v35 = vsub.f32 %v287_v34, %v269_v33  ;;  %vm627_vm12 = vcmp.eq.s32.totalorder %v1032_v13, 1  ;;  %vm625_vm13 = vcmp.eq.s32.totalorder %v1032_v13, 0  ;;  %v1033_v54 = vadd.s32 4294967291, %v1032_v13 }
 0x12a   : > { %1144 = vrcp.f32 %v288_v35 }
 0x12b   : > { %1146 = vlog2.f32 %v205_v8 }
 0x12c   : > { %1148 = vlog2.f32 %v208_v7 }
 0x12d   : > { %1150 = vlog2.f32 %v1328_v20 }
 0x134   : > { %v1145_v36 = vpop.eup %1144 }
 0x135   : > { %v290_v37 = vmul.f32 %v1145_v36, %v269_v33  ;;  %v1147_v42 = vpop.eup %1146 }
 0x136   : > { %v547_v44 = vmul.f32 0.6931472, %v1147_v42  ;;  %v1149_v46 = vpop.eup %1148 }
 0x137   : > { %v292_v38 = vsel %vm291_vm0, %v290_v37, -inf  ;;  %v549_v49 = vmul.f32 0.6931472, %v1149_v46  ;;  %v1151_v61 = vpop.eup %1150 }
 0x138   : > { %293 = vmax.xlane.f32.xlu1 %v292_v38  ;;  %v551_v62 = vmul.f32 0.6931472, %v1151_v61 }
 0x13a   : > { %v570_v6 = vrot.slane %v551_v62, %v266_v21 }
 0x13e   : > { %v241_v12 = vpop.permute.xlu0 %240 }
 0x13f   : > { %vm242_vm6 = vcmp.eq.s32.totalorder %v241_v12, %v1346_v41  ;;  %vm243_vm7 = vcmp.eq.s32.totalorder %v241_v12, %v238_v10 }
 0x140   : > { %1064 = vmatprep.subr.msk.mxu1 %vm243_vm7, %v1229_v14 }
 0x141   : > { %1065 = vmatpush1.msk.msra.mxu1 %vm242_vm6, %v1229_v14 }
 0x149   : > { %554 = vperm.xlu1 %1127, %v547_v44  }
 0x14d   : > { %1130 = vset.pattern.permute.xlu1 %v1220_v0  ;;  %v560_v0 = vrot.slane %v551_v62, %v1332_v22  ;;  %v1068_v22 = vtrunc.f32 %v1299_v2 }
 0x14e   : > { %564 = vperm.xlu1 %1130, %v549_v49  }
 0x14f   : > { %v1069_v24 = vcvt.f32.s32 %v1068_v22 }
 0x152   : > { %1132 = vset.pattern.permute.xlu1 %v1226_v52 }
 0x153   : > { %582 = vperm.xlu1 %1132, %v228_v51  }
 0x157   : > { %1133 = vset.pattern.permute.xlu1 %v1227_v53 }
 0x1c5   : > { %v294_v63 = vpop.xlane.xlu1 %293 }
 0x1c6   : > { %vm295_vm5 = vcmp.ge.f32.partialorder %v290_v37, %v294_v63  ;;  %v1035_v63 = vadd.s32 4294967291, %v1034_v40 }
 0x1c7   : > { %v1018_v3 = vsel %vm295_vm5, 1.0, %v1223_v11  ;;  %vm637_vm5 = vcmp.eq.s32.totalorder %v1032_v13, 3 }
 0x1c8   : > { %1057 = vmatmul.mubr.msk.f32.vlgmr.msra.gmra.mrb[0].mxu0 %vm291_vm0, %v1018_v3 }
 0x1c9   : > { %v555_v4 = vpop.permute.xlu1 %554  ;;  %1061 = vmatprep.mubr.msk.f32.mxu0 %vm1225_vm3, %v1223_v11  ;;  %vm630_vm3 = vcmp.eq.s32.totalorder %v1032_v13, 2 }
 0x1ca   : > { %v561_v5 = vsub.f32 %v555_v4, %v560_v0 }
 0x1cc   : > { %590 = vperm.xlu1 %1133, %v561_v5  }
 0x1cd   : > { %v565_v7 = vpop.permute.xlu1 %564 }
 0x1ce   : > { %v571_v8 = vsub.f32 %v565_v7, %v570_v6 }
 0x1d0   : > { %1134 = vset.pattern.permute.xlu1 %v1226_v52 }
 0x1d1   : > { %632 = vperm.xlu1 %1134, %v561_v5  }
 0x1d2   : > { %v583_v19 = vpop.permute.xlu1 %582 }
 0x1d3   : > { %v628_v43 = vsel %vm627_vm12, %v583_v19, 0.0  ;;  %v585_v45 = vsel %vm579_vm14, %v583_v19, 0.0  ;;  %vm607_vm12 = vcmp.lt.s32.totalorder %v1346_v41, 25 }
 0x1d5   : > { %1135 = vset.pattern.permute.xlu1 %v1227_v53 }
 0x1d6   : > { %598 = vperm.xlu1 %1135, %v571_v8  }
 0x1da   : > { %1136 = vset.pattern.permute.xlu1 %v1226_v52 }
 0x1db   : > { %639 = vperm.xlu1 %1136, %v571_v8  }
 0x1df   : > { %1137 = vset.pattern.permute.xlu1 %v1221_v1 }
 0x1e0   : > { %669 = vperm.xlu1 %1137, %v561_v5  }
 0x1e4   : > { %1138 = vset.pattern.permute.xlu1 %v1230_v23 }
 0x1e5   : > { %611 = vperm.xlu1 %1138, %v1069_v24  }
 0x1e9   : > { %1139 = vset.pattern.permute.xlu1 %v1221_v1 }
 0x1ea   : > { %676 = vperm.xlu1 %1139, %v571_v8  }
 0x1ee   : > { %1140 = vset.pattern.permute.xlu1 %v1227_v53 }
 0x24b   : > { %v591_v36 = vpop.permute.xlu1 %590 }
 0x250   : > { %v633_v37 = vpop.permute.xlu1 %632 }
 0x251   : > { %v635_v53 = vsel %vm630_vm3, %v633_v37, 0.0 }
 0x255   : > { %v599_v38 = vpop.permute.xlu1 %598 }
 0x256   : > { %v601_v57 = vsel %vm595_vm4, %v599_v38, 0.0 }
 0x25a   : > { %v640_v39 = vpop.permute.xlu1 %639 }
 0x25b   : > { %v642_v58 = vsel %vm637_vm5, %v640_v39, 0.0  ;;  %vm681_vm5 = vcmp.eq.s32.totalorder %v1034_v40, 4 }
 0x25c   : > { %v682_v10 = vsel %vm681_vm5, 1.0, %v1223_v11 }
 0x25f   : > { %v670_v42 = vpop.permute.xlu1 %669 }
 0x264   : > { %v612_v48 = vpop.permute.xlu1 %611 }
 0x265   : > { %vm651_vm14 = vcmp.eq.s32.totalorder %v1033_v54, %v612_v48  ;;  %vm613_vm3 = vcmp.eq.s32.totalorder %v1031_v59, %v612_v48 }
 0x269   : > { %v677_v61 = vpop.permute.xlu1 %676 }
 0x26a   : > { %v679_v4 = vsel %vm674_vm9, %v677_v61, 0.0 }
 0x29b   : > { %v376_v15 = vpop.f32.mrb[0].mxu0 }
 0x29c   : > { %vm380_vm8 = vcmp.lt.f32.partialorder %v376_v15, 0.5  ;;  %v1058_v16 = vpop.f32.mrb[1].mxu0 }
 0x29d   : > { %v1022_v18 = vsel %vm380_vm8, 1.0, %v1223_v11  ;;  %vm648_vm8 = vcmp.lt.s32.totalorder %v1032_v13, 25 }
 0x29e   : > { %v383_v20 = vmul.f32 %v1022_v18, %v1018_v3 }
 0x2a0   : > { %v389_v21 = vmul.f32 %v387_v9, %v383_v20 }
 0x2a2   : > { %1060 = vmatpush3.xpose.msk.msra.mxu0 %vm291_vm0, %v389_v21 }
 0x2a3   : > { %1025 = vmatprep.subr.msk.mxu0 %vm243_vm7, %v1229_v14 }
 0x2a5   : > { %1062 = vmatmul.mubr.msk.f32.vlgmr.msra.gmra.mrb[2].mxu0 %vm291_vm0, %v389_v21  ;;  %vm664_vm0 = vcmp.eq.s32.totalorder %v1034_v40, 1 }
 0x2a6   : > { %1026 = vmatpush1.xpose.msk.msra.mxu0 %vm242_vm6, %v1229_v14  ;;  %1027 = vmatprep.mubr.msk.f32.mxu0 %vm243_vm7, %v1229_v14  ;;  %v665_v49 = vsel %vm664_vm0, %v583_v19, 0.0 }
 0x2a7   : > { %1036 = vmatprep.subr.msk.mxu0 %vm243_vm7, %v1229_v14  ;;  %vm647_vm7 = vcmp.ge.s32.totalorder %v1032_v13, 5 }
 0x2a8   : > { %vm649_vm0 = vmand %vm647_vm7, %vm648_vm8 }
 0x2a9   : > { %1028 = vmatmul.mubr.msk.f32.vlgmr.msra.gmra.mrb[4].mxu0 %vm242_vm6, %v1229_v14 }
 0x2aa   : > { %1037 = vmatpush1.msk.msra.mxu0 %vm242_vm6, %v1229_v14  ;;  %824 = vmatprep.mubr.f32.mxu0 %v1223_v11  ;;  %vm667_vm6 = vcmp.eq.s32.totalorder %v1034_v40, 2 }
 0x2ab   : > { %v672_v62 = vsel %vm667_vm6, %v670_v42, 0.0  ;;  %vm688_vm6 = vcmp.eq.s32.totalorder %v1035_v63, %v612_v48 }
 0x378   : > { %v459_v25 = vpop.f32.mrb[2].mxu0 }
 0x379   : > { %v1063_v26 = vpop.f32.mrb[3].mxu0 }
 0x37c   : > { %v529_v27 = vpop.f32.mrb[4].mxu0 }
 0x37d   : > { %v533_v29 = vmul.f32 %v529_v27, %v459_v25  ;;  %v531_v30 = vpop.f32.mrb[5].mxu0 }
 0x37f   : > { %v537_v2 = vmul.f32 %v1029_v28, %v533_v29 }
 0x381   : > { %v539_v31 = vsel %vm1483_vm10, %v537_v2, 0.0  ;;  %vm652_vm10 = vmand %vm649_vm0, %vm651_vm14 }
 0x382   : > { %540 = vadd.xlane.f32.xlu0 %v539_v31  ;;  %v653_v12 = vsel %vm652_vm10, 1.0, %v1223_v11  ;;  %vm1484_vm10 = vcmask 64512  }
 0x383   : > { %vm1488_vm14 = vmmov %vm1484_vm10 }
 0x384   : > { %vm1490_vm0 = vmmov %vm1484_vm10 }
 0x398   : > { %575 = vperm.xlu0 %1131, %v227_v32  }
 0x40f   : > { %v541_v33 = vpop.xlane.xlu0 %540 }
 0x410   : > { %vm542_vm11 = vcmp.lt.f32.partialorder %v541_v33, 0.5 }
 0x411   : > { %v1030_v34 = vsel %vm542_vm11, 1.0, %v1223_v11  ;;  %vm606_vm11 = vcmp.ge.s32.totalorder %v1346_v41, 5 }
 0x412   : > { %v545_v35 = vmul.f32 %v1030_v34, %v389_v21  ;;  %vm608_vm4 = vmand %vm606_vm11, %vm607_vm12 }
 0x413   : > { %vm614_vm8 = vmand %vm608_vm4, %vm613_vm3 }
 0x414   : > { %619 = vperm.xlu1 %1140, %v545_v35   ;;  %v615_v15 = vsel %vm614_vm8, 1.0, %v1223_v11  ;;  %vm1485_vm11 = vmmov %vm1484_vm10 }
 0x415   : > { %vm1486_vm12 = vmmov %vm1484_vm10 }
 0x416   : > { %vm1493_vm3 = vmmov %vm1490_vm0 }
 0x417   : > { %v576_v17 = vpop.permute.xlu0 %575 }
 0x418   : > { %1141 = vset.pattern.permute.xlu1 %v1226_v52  ;;  %v626_v44 = vsel %vm625_vm13, %v576_v17, 0.0  ;;  %v578_v46 = vsel %vm572_vm15, %v576_v17, 0.0  ;;  %v663_v50 = vsel %vm662_vm1, %v576_v17, 0.0  ;;  %v593_v52 = vsel %vm587_vm2, %v591_v36, 0.0 }
 0x419   : > { %656 = vperm.xlu1 %1141, %v545_v35   ;;  %v629_v47 = vadd.f32 %v628_v43, %v626_v44  ;;  %v586_v51 = vadd.f32 %v585_v45, %v578_v46  ;;  %v666_v56 = vadd.f32 %v665_v49, %v663_v50  ;;  %vm644_vm13 = vcmp.eq.s32.totalorder %v1032_v13, 4 }
 0x41a   : > { %vm603_vm15 = vcmp.eq.s32.totalorder %v1346_v41, 4  ;;  %vm684_vm1 = vcmp.ge.s32.totalorder %v1034_v40, 5  ;;  %vm685_vm2 = vcmp.lt.s32.totalorder %v1034_v40, 25  ;;  %v645_v5 = vsel %vm644_vm13, 1.0, %v1223_v11  ;;  %vm1487_vm13 = vmmov %vm1484_vm10 }
 0x41b   : > { %v636_v55 = vadd.f32 %v635_v53, %v629_v47  ;;  %v594_v60 = vadd.f32 %v593_v52, %v586_v51  ;;  %v673_v0 = vadd.f32 %v672_v62, %v666_v56  ;;  %v604_v7 = vsel %vm603_vm15, 1.0, %v1223_v11  ;;  %vm686_vm7 = vmand %vm684_vm1, %vm685_vm2 }
 0x41c   : > { %vm689_vm9 = vmand %vm686_vm7, %vm688_vm6 }
 0x41d   : > { %1142 = vset.pattern.permute.xlu1 %v1221_v1  ;;  %v643_v3 = vadd.f32 %v642_v58, %v636_v55  ;;  %v602_v6 = vadd.f32 %v601_v57, %v594_v60  ;;  %v680_v41 = vadd.f32 %v679_v4, %v673_v0  ;;  %v690_v21 = vsel %vm689_vm9, 1.0, %v1223_v11  ;;  %vm1489_vm15 = vmmov %vm1484_vm10 }
 0x41e   : > { %693 = vperm.xlu1 %1142, %v545_v35   ;;  %vm1491_vm1 = vmmov %vm1490_vm0 }
 0x41f   : > { %v646_v9 = vadd.f32 %v645_v5, %v643_v3  ;;  %v605_v14 = vadd.f32 %v604_v7, %v602_v6  ;;  %v683_v16 = vadd.f32 %v682_v10, %v680_v41  ;;  %vm1492_vm2 = vmmov %vm1490_vm0 }
 0x421   : > { %v654_v18 = vadd.f32 %v653_v12, %v646_v9  ;;  %v616_v22 = vadd.f32 %v615_v15, %v605_v14  ;;  %v691_v25 = vadd.f32 %v690_v21, %v683_v16 }
 0x493   : > { %v620_v8 = vpop.permute.xlu1 %619 }
 0x494   : > { %v622_v24 = vmul.f32 %v620_v8, %v616_v22 }
 0x498   : > { %v657_v20 = vpop.permute.xlu1 %656 }
 0x499   : > { %v659_v23 = vmul.f32 %v657_v20, %v654_v18 }
 0x49b   : > { %v660_v27 = vadd.f32 %v659_v23, %v622_v24 }
 0x49d   : > { %v694_v26 = vpop.permute.xlu1 %693 }
 0x49e   : > { %v696_v28 = vmul.f32 %v694_v26, %v691_v25 }
 0x4a0   : > { %v697_v29 = vadd.f32 %v696_v28, %v660_v27 }
 0x4a2   : > { %698 = vxpose.xlu0.b32.start.end [1/1] (short) (narrow) %v697_v29, 80 }
 0x4cb   : > { %1143 = vset.pattern.permute.xlu0 %v1221_v1 }
 0x522   : > { %v714_v30 = vpop.trf.xlu0 }
 0x523   : > { %1038 = vmatmul.mubr.msk.f32.vlgmr.msra.gmra.mrb[6].mxu0 %vm1484_vm10, %v714_v30 }
 0x524   : > { %830 = vmatprep.mubr.f32.mxu0 %v1223_v11 }
 0x526   : > { %v715_v2 = vpop.trf.xlu0 }
 0x527   : > { %1039 = vmatmul.mubr.msk.f32.gmra.mrb[8].mxu0 %vm1485_vm11, %v715_v2 }
 0x528   : > { %836 = vmatprep.mubr.f32.mxu0 %v1223_v11 }
 0x52a   : > { %v716_v31 = vpop.trf.xlu0 }
 0x52b   : > { %1040 = vmatmul.mubr.msk.f32.gmra.mrb[10].mxu0 %vm1486_vm12, %v716_v31 }
 0x52c   : > { %842 = vmatprep.mubr.f32.mxu0 %v1223_v11 }
 0x52e   : > { %v717_v32 = vpop.trf.xlu0 }
 0x52f   : > { %1041 = vmatmul.mubr.msk.f32.gmra.mrb[12].mxu0 %vm1487_vm13, %v717_v32 }
 0x532   : > { %v718_v33 = vpop.trf.xlu0 }
 0x533   : > { %1042 = vmatmul.mubr.msk.f32.vlgmr.msra.gmra.mrb[0].mxu1 %vm1488_vm14, %v718_v33 }
 0x534   : > { %854 = vmatprep.mubr.f32.mxu1 %v1223_v11 }
 0x536   : > { %v719_v1 = vpop.trf.xlu0 }
 0x537   : > { %1043 = vmatmul.mubr.msk.f32.gmra.mrb[2].mxu1 %vm1489_vm15, %v719_v1 }
 0x538   : > { %860 = vmatprep.mubr.f32.mxu1 %v1223_v11 }
 0x53a   : > { %v720_v34 = vpop.trf.xlu0 }
 0x53b   : > { %1044 = vmatmul.mubr.msk.f32.gmra.mrb[4].mxu1 %vm1490_vm0, %v720_v34 }
 0x53c   : > { %866 = vmatprep.mubr.f32.mxu1 %v1223_v11 }
 0x53e   : > { %v721_v35 = vpop.trf.xlu0 }
 0x53f   : > { %1045 = vmatmul.mubr.msk.f32.gmra.mrb[6].mxu1 %vm1491_vm1, %v721_v35 }
 0x540   : > { %872 = vmatprep.mubr.f32.mxu1 %v1223_v11 }
 0x542   : > { %v722_v19 = vpop.trf.xlu0 }
 0x543   : > { %1046 = vmatmul.mubr.msk.f32.gmra.mrb[8].mxu1 %vm1492_vm2, %v722_v19 }
 0x544   : > { %878 = vmatprep.mubr.f32.mxu1 %v1223_v11 }
 0x546   : > { %v723_v36 = vpop.trf.xlu0 }
 0x547   : > { %1047 = vmatmul.mubr.msk.f32.gmra.mrb[10].mxu1 %vm1493_vm3, %v723_v36 }
 0x5f6   : > { %v826_v37 = vpop.f32.mrb[6].mxu0 }
 0x5f7   : > { %885 = vst [vmem:[%s1441_s10] sm:$0xff] %v826_v37  ;;  %v828_v11 = vpop.f32.mrb[7].mxu0 }
 0x5f8   : > { %886 = vst [vmem:[%s1441_s10 + $0x8] sm:$0xff] %v828_v11 }
 0x5fa   : > { %v832_v38 = vpop.f32.mrb[8].mxu0 }
 0x5fb   : > { %887 = vst [vmem:[%s1441_s10 + $0x10] sm:$0xff] %v832_v38  ;;  %v834_v39 = vpop.f32.mrb[9].mxu0 }
 0x5fc   : > { %888 = vst [vmem:[%s1441_s10 + $0x18] sm:$0xff] %v834_v39 }
 0x5fe   : > { %v838_v13 = vpop.f32.mrb[10].mxu0 }
 0x5ff   : > { %889 = vst [vmem:[%s1441_s10 + $0x20] sm:$0xff] %v838_v13  ;;  %v840_v17 = vpop.f32.mrb[11].mxu0 }
 0x600   : > { %890 = vst [vmem:[%s1441_s10 + $0x28] sm:$0xff] %v840_v17 }
 0x602   : > { %v844_v40 = vpop.f32.mrb[12].mxu0 }
 0x603   : > { %891 = vst [vmem:[%s1441_s10 + $0x30] sm:$0xff] %v844_v40  ;;  %v846_v42 = vpop.f32.mrb[13].mxu0 }
 0x604   : > { %892 = vst [vmem:[%s1441_s10 + $0x38] sm:$0xff] %v846_v42 }
 0x606   : > { %v850_v43 = vpop.f32.mrb[0].mxu1 }
 0x607   : > { %893 = vst [vmem:[%s1441_s10 + $0x40] sm:$0xff] %v850_v43  ;;  %v852_v44 = vpop.f32.mrb[1].mxu1 }
 0x608   : > { %894 = vst [vmem:[%s1441_s10 + $0x48] sm:$0xff] %v852_v44 }
 0x60a   : > { %v856_v45 = vpop.f32.mrb[2].mxu1 }
 0x60b   : > { %895 = vst [vmem:[%s1441_s10 + $0x50] sm:$0xff] %v856_v45  ;;  %v858_v46 = vpop.f32.mrb[3].mxu1 }
 0x60c   : > { %896 = vst [vmem:[%s1441_s10 + $0x58] sm:$0xff] %v858_v46 }
 0x60e   : > { %v862_v47 = vpop.f32.mrb[4].mxu1 }
 0x60f   : > { %897 = vst [vmem:[%s1441_s10 + $0x60] sm:$0xff] %v862_v47  ;;  %v864_v48 = vpop.f32.mrb[5].mxu1 }
 0x610   : > { %898 = vst [vmem:[%s1441_s10 + $0x68] sm:$0xff] %v864_v48 }
 0x612   : > { %v868_v49 = vpop.f32.mrb[6].mxu1 }
 0x613   : > { %899 = vst [vmem:[%s1441_s10 + $0x70] sm:$0xff] %v868_v49  ;;  %v870_v50 = vpop.f32.mrb[7].mxu1 }
 0x614   : > { %900 = vst [vmem:[%s1441_s10 + $0x78] sm:$0xff] %v870_v50 }
 0x616   : > { %v874_v51 = vpop.f32.mrb[8].mxu1 }
 0x617   : > { %901 = vst [vmem:[%s1441_s10 + $0x80] sm:$0xff] %v874_v51  ;;  %v876_v52 = vpop.f32.mrb[9].mxu1 }
 0x618   : > { %902 = vst [vmem:[%s1441_s10 + $0x88] sm:$0xff] %v876_v52 }
 0x61a   : > { %v880_v53 = vpop.f32.mrb[10].mxu1 }
 0x61b   : > { %903 = vst [vmem:[%s1441_s10 + $0x90] sm:$0x7] %v880_v53  ;;  %v882_v54 = vpop.f32.mrb[11].mxu1 }
 0x61c   : > { %904 = vst [vmem:[%s1441_s10 + $0x98] sm:$0x7] %v882_v54 }
 0x61d PF: > { %s24_s27 = sadd.s32 1, %s1216_s27   ;;  %s1494_s1 = smov %s1208_s25 }
 0x61e   : > { %p21_p3 = scmp.ge.s32.totalorder %s24_s27, 6   ;;  %s1495_s24 = smov %s1212_s26 }
 0x61f   : > { %s1496_s25 = smov %s1499_s28  ;;  %s1497_s26 = smov %s1503_s29 }
 0x620   :  { %23 = sbr.rel (!%p21_p3) target bundleno = 28 (0x1c), region = 61 }

</bundles_post_ra>
